<compile_context>
chip_gen: v7x
topology: tpu7x:2x2x1
jax: 0.10.0
libtpu: 0.0.40
codegen_flags: <defaults>
</compile_context>

<pallas_src>
import jax
import jax.numpy as jnp
from jax.experimental import pallas as pl
from jax.experimental.pallas import tpu as pltpu


def _round_up(x, m):
    return (x + m - 1) // m * m


def _vmem_cap_bytes():
    """Generation-aware VMEM ceiling: ~3/4 of physical VMEM.

    ~96 MiB on the 128-MiB v5e/v6e parts, ~48 MiB on v7x's 64 MiB per-TC VMEM.
    Falls back to a v7x-safe value if the hardware query is unavailable.
    """
    cap = None
    try:
        cap = getattr(pltpu.get_tpu_info(), "vmem_capacity_bytes", None)
    except Exception:
        cap = None
    if not cap or cap <= 0:
        cap = 64 * 1024 * 1024  # conservative: assume v7x-sized VMEM
    return (cap * 3) // 4


def qnet_kernel(s_ref, w1_ref, b1_ref, w2_ref, b2_ref, w3_ref, b3_ref, o_ref):
    # Cast the activation tile to the weights' dtype (bf16) inside the kernel:
    # keeps the HBM-side input narrow/unchanged and avoids a wrapper-side cast pass.
    x = s_ref[...].astype(w1_ref.dtype)
    # Layer 1: Linear (bf16 MXU operands, f32 accumulate) + bias + ReLU in f32.
    # H1 is padded to a lane multiple at param-prep time, so bias+ReLU are lane-dense.
    h1 = jnp.dot(x, w1_ref[...], preferred_element_type=jnp.float32)
    h1 = jnp.maximum(h1 + b1_ref[...], 0.0)
    # Layer 2: Linear + ReLU (lane-dense: H2 padded).
    h2 = jnp.dot(h1.astype(w2_ref.dtype), w2_ref[...],
                 preferred_element_type=jnp.float32)
    h2 = jnp.maximum(h2 + b2_ref[...], 0.0)
    # Layer 3: Linear + Identity.  Output keeps the true (small) action dim:
    # fewer HBM bytes beats an unmasked full-lane store when A << 128.
    q = jnp.dot(h2.astype(w3_ref.dtype), w3_ref[...],
                preferred_element_type=jnp.float32)
    o_ref[...] = (q + b3_ref[...]).astype(o_ref.dtype)


def _resident_spec(a, single_buffer):
    """Whole array as one block; same block index at every grid step (VMEM-resident).

    With `single_buffer`, request Buffered(1): the block never changes, so the
    pipeliner's default double buffer would only waste VMEM (matters on v7x's
    64 MiB once hid_shape grows into the K range; skipped for tiny params to
    keep the common path on the default pipeline mode).
    """
    if single_buffer:
        return pl.BlockSpec(a.shape, lambda i: (0,) * a.ndim,
                            pipeline_mode=pl.Buffered(1))
    return pl.BlockSpec(a.shape, lambda i: (0,) * a.ndim)


def q_net_forward(s, params, *, block_b=1024):
    """Pallas forward of Q_Net.

    s:      (B, state_dim) float32 (or bf16).
    params: output of prepare_params_for_kernel — weights (in, out) bf16 with
            hidden dims pre-padded to a lane multiple, biases (1, out) f32.
    Returns (B, action_dim) float32 Q-values.
    """
    w1, b1, w2, b2, w3, b3 = params
    B, Sd = s.shape
    assert w1.shape[0] == Sd, "state_dim mismatch between s and w1"
    H1p, H2p = w1.shape[1], w2.shape[1]
    A = w3.shape[1]

    # ---- batch tiling: TB multiple of 8 (sublane), B padded to multiple of TB --
    TB = _round_up(min(block_b, _round_up(max(B, 1), 8)), 8)
    if B > 8 and _round_up(B, TB) // TB < 2:
        # Guarantee >=2 grid steps so the "parallel" batch axis can shard across
        # both TensorCores on v7x (2 TC/chip); no-op for tiny batches.
        TB = _round_up((B + 1) // 2, 8)
    Bp = _round_up(B, TB)
    if Bp != B:
        # Zero-padded rows produce nonzero garbage Q (bias flows through ReLU);
        # they are sliced off below — never reduce/argmax over padded rows.
        s = jnp.pad(s, ((0, Bp - B), (0, 0)))

    grid = (Bp // TB,)

    param_bytes = sum(a.size * a.dtype.itemsize for a in (w1, b1, w2, b2, w3, b3))
    single_buffer_params = param_bytes > (4 << 20)  # only worth it when params are big

    # ---- scheduling hints (real HBM traffic: narrow in/out + resident params) --
    flops = 2 * Bp * (Sd * H1p + H1p * H2p + H2p * A)
    bytes_accessed = (s.size * s.dtype.itemsize + param_bytes + Bp * A * 4)
    cost = pl.CostEstimate(flops=flops, transcendentals=0,
                           bytes_accessed=bytes_accessed)

    # ---- VMEM budget: pipelined act tiles + resident params + f32 intermediates
    act_bytes = 2 * TB * (Sd * s.dtype.itemsize + A * 4)
    hidden_bytes = 2 * TB * (H1p + H2p) * 4  # both f32 intermediates + compiler temps
    needed = 2 * (param_bytes + act_bytes + hidden_bytes)
    vmem_limit = int(min(_vmem_cap_bytes(), max(16 * 1024 * 1024, needed)))

    out = pl.pallas_call(
        qnet_kernel,
        out_shape=jax.ShapeDtypeStruct((Bp, A), jnp.float32),
        grid=grid,
        in_specs=[
            # batch-tiled input; last dim == full array dim (legal, keeps HBM bytes low)
            pl.BlockSpec((TB, Sd), lambda i: (i, 0)),
            _resident_spec(w1, single_buffer_params),
            _resident_spec(b1, single_buffer_params),
            _resident_spec(w2, single_buffer_params),
            _resident_spec(b2, single_buffer_params),
            _resident_spec(w3, single_buffer_params),
            _resident_spec(b3, single_buffer_params),
        ],
        # unpadded output tile: last dim == full array dim (A), minimal writeback
        out_specs=pl.BlockSpec((TB, A), lambda i: (i, 0)),
        compiler_params=pltpu.CompilerParams(
            dimension_semantics=("parallel",),   # megacore-shardable batch axis
            vmem_limit_bytes=vmem_limit),
        cost_estimate=cost,
    )(s, w1, b1, w2, b2, w3, b3)

    return out if Bp == B else out[:B]


def init_params(key, state_dim, hid_shape, action_dim):
    """Deterministic synthetic init matching Q_Net layer shapes (f32 master copy)."""
    layers = [state_dim] + list(hid_shape) + [action_dim]
    params = []
    keys = jax.random.split(key, 2 * (len(layers) - 1))
    for j in range(len(layers) - 1):
        fan_in, fan_out = layers[j], layers[j + 1]
        bound = 1.0 / jnp.sqrt(jnp.float32(fan_in))
        w = jax.random.uniform(keys[2 * j], (fan_in, fan_out),
                               minval=-bound, maxval=bound, dtype=jnp.float32)
        # biases kept 2D (1, fan_out) for TPU-friendly layout; broadcast over batch
        b = jax.random.uniform(keys[2 * j + 1], (1, fan_out),
                               minval=-bound, maxval=bound, dtype=jnp.float32)
        params += [w, b]
    return tuple(params)


def prepare_params_for_kernel(params, compute_dtype=jnp.bfloat16, lane_multiple=128):
    """ONE-TIME param prep (no per-call wrapper passes):

    * zero-pads the hidden dims H1/H2 up to `lane_multiple` so weights, biases
      and the in-VMEM intermediates h1/h2 are lane-dense.  Numerically inert:
      ReLU(0 + 0 bias) = 0 and zero weight rows contribute nothing downstream.
    * casts weights to bf16 (MXU operands, halved weight DMA); biases stay f32.
    * state_dim and action_dim are NOT padded: they are the HBM-streamed dims
      and fewer bytes wins for this mem-bound kernel (block == full dim is legal).
    * lane_multiple=256 fills the full v6e/v7x MXU width — only relevant once
      hid_shape itself approaches MXU-bound sizes.
    """
    w1, b1, w2, b2, w3, b3 = params
    H1, H2 = w1.shape[1], w2.shape[1]
    H1p = _round_up(H1, lane_multiple)
    H2p = _round_up(H2, lane_multiple)
    w1 = jnp.pad(w1, ((0, 0), (0, H1p - H1)))
    b1 = jnp.pad(b1, ((0, 0), (0, H1p - H1)))
    w2 = jnp.pad(w2, ((0, H1p - H1), (0, H2p - H2)))
    b2 = jnp.pad(b2, ((0, 0), (0, H2p - H2)))
    w3 = jnp.pad(w3, ((0, H2p - H2), (0, 0)))
    return (w1.astype(compute_dtype), b1,
            w2.astype(compute_dtype), b2,
            w3.astype(compute_dtype), b3)


def q_net_reference(s, params):
    """Pure-JAX f32 reference with the exact Q_Net forward semantics."""
    w1, b1, w2, b2, w3, b3 = params
    hp = jax.lax.Precision.HIGHEST
    h1 = jnp.maximum(jnp.dot(s, w1, precision=hp) + b1, 0.0)
    h2 = jnp.maximum(jnp.dot(h1, w2, precision=hp) + b2, 0.0)
    return jnp.dot(h2, w3, precision=hp) + b3


if __name__ == "__main__":
    # Small shapes consistent with Q_Net(state_dim, action_dim, hid_shape)
    batch, state_dim, action_dim = 2, 16, 8
    hid_shape = (32, 32)

    key = jax.random.PRNGKey(0)
    k_s, k_p = jax.random.split(key)
    s = jax.random.normal(k_s, (batch, state_dim), dtype=jnp.float32)

    params_f32 = init_params(k_p, state_dim, hid_shape, action_dim)
    # one-time: pad hidden dims to lane multiples + cast weights to bf16
    params_kernel = prepare_params_for_kernel(params_f32)

    q = q_net_forward(s, params_kernel)
    q = jax.block_until_ready(q)

    q_ref = q_net_reference(s, params_f32)
    assert q.shape == (batch, action_dim)
    # bf16 MXU operands / bf16 inter-layer activations with f32 accumulation vs.
    # the f32 reference: allow bf16-level error.
    assert jnp.allclose(q, q_ref, atol=5e-2, rtol=5e-2), (
        f"max abs diff = {jnp.max(jnp.abs(q - q_ref))}")

    print("KERNEL_OK")
</pallas_src>

<mosaic_0001>
module attributes {stable_mosaic.version = 11 : i64} {
  func.func @qnet_kernel(%arg0: i32, %arg1: memref<8x16xf32, #tpu.memory_space<vmem>>, %arg2: memref<16x128xbf16, #tpu.memory_space<vmem>>, %arg3: memref<1x128xf32, #tpu.memory_space<vmem>>, %arg4: memref<128x128xbf16, #tpu.memory_space<vmem>>, %arg5: memref<1x128xf32, #tpu.memory_space<vmem>>, %arg6: memref<128x8xbf16, #tpu.memory_space<vmem>>, %arg7: memref<1x8xf32, #tpu.memory_space<vmem>>, %arg8: memref<8x8xf32, #tpu.memory_space<vmem>>) attributes {dimension_semantics = [#tpu.dimension_semantics<parallel>], iteration_bounds = array<i64: 1>, scalar_prefetch = 0 : i64, scratch_operands = 0 : i64, tpu.core_type = #tpu.core_type<tc>, window_params = [{transform_indices = @transform_0, window_bounds = array<i64: 8, 16>}, {pipeline_mode = #tpu.pipeline_mode<synchronous>, transform_indices = @transform_1, window_bounds = array<i64: 16, 128>}, {pipeline_mode = #tpu.pipeline_mode<synchronous>, transform_indices = @transform_2, window_bounds = array<i64: 1, 128>}, {pipeline_mode = #tpu.pipeline_mode<synchronous>, transform_indices = @transform_3, window_bounds = array<i64: 128, 128>}, {pipeline_mode = #tpu.pipeline_mode<synchronous>, transform_indices = @transform_4, window_bounds = array<i64: 1, 128>}, {pipeline_mode = #tpu.pipeline_mode<synchronous>, transform_indices = @transform_5, window_bounds = array<i64: 128, 8>}, {pipeline_mode = #tpu.pipeline_mode<synchronous>, transform_indices = @transform_6, window_bounds = array<i64: 1, 8>}, {transform_indices = @transform_7, window_bounds = array<i64: 8, 8>}]} {
    %c0 = arith.constant 0 : index
    %c0_0 = arith.constant 0 : index
    %0 = vector.load %arg1[%c0, %c0_0] : memref<8x16xf32, #tpu.memory_space<vmem>>, vector<8x16xf32>
    %1 = arith.truncf %0 : vector<8x16xf32> to vector<8x16xbf16>
    %c0_1 = arith.constant 0 : index
    %c0_2 = arith.constant 0 : index
    %2 = vector.load %arg2[%c0_1, %c0_2] : memref<16x128xbf16, #tpu.memory_space<vmem>>, vector<16x128xbf16>
    %cst = arith.constant dense<0.000000e+00> : vector<8x128xf32>
    %3 = tpu.matmul %1, %2, %cst {dimension_numbers = #tpu.dot_dimension_numbers<[1], [0], [0], [1], [0, 0, 1, 1], [], []>} : vector<8x16xbf16>, vector<16x128xbf16>, vector<8x128xf32> -> vector<8x128xf32>
    %c0_3 = arith.constant 0 : index
    %c0_4 = arith.constant 0 : index
    %4 = vector.load %arg3[%c0_3, %c0_4] : memref<1x128xf32, #tpu.memory_space<vmem>>, vector<1x128xf32>
    %5 = vector.broadcast %4 : vector<1x128xf32> to vector<8x128xf32>
    %6 = arith.addf %3, %5 : vector<8x128xf32>
    %cst_5 = arith.constant 0.000000e+00 : f32
    %7 = vector.broadcast %cst_5 : f32 to vector<8x128xf32>
    %8 = arith.maximumf %6, %7 : vector<8x128xf32>
    %9 = arith.truncf %8 : vector<8x128xf32> to vector<8x128xbf16>
    %c0_6 = arith.constant 0 : index
    %c0_7 = arith.constant 0 : index
    %10 = vector.load %arg4[%c0_6, %c0_7] : memref<128x128xbf16, #tpu.memory_space<vmem>>, vector<128x128xbf16>
    %cst_8 = arith.constant dense<0.000000e+00> : vector<8x128xf32>
    %11 = tpu.matmul %9, %10, %cst_8 {dimension_numbers = #tpu.dot_dimension_numbers<[1], [0], [0], [1], [0, 0, 1, 1], [], []>} : vector<8x128xbf16>, vector<128x128xbf16>, vector<8x128xf32> -> vector<8x128xf32>
    %c0_9 = arith.constant 0 : index
    %c0_10 = arith.constant 0 : index
    %12 = vector.load %arg5[%c0_9, %c0_10] : memref<1x128xf32, #tpu.memory_space<vmem>>, vector<1x128xf32>
    %13 = vector.broadcast %12 : vector<1x128xf32> to vector<8x128xf32>
    %14 = arith.addf %11, %13 : vector<8x128xf32>
    %cst_11 = arith.constant 0.000000e+00 : f32
    %15 = vector.broadcast %cst_11 : f32 to vector<8x128xf32>
    %16 = arith.maximumf %14, %15 : vector<8x128xf32>
    %17 = arith.truncf %16 : vector<8x128xf32> to vector<8x128xbf16>
    %c0_12 = arith.constant 0 : index
    %c0_13 = arith.constant 0 : index
    %18 = vector.load %arg6[%c0_12, %c0_13] : memref<128x8xbf16, #tpu.memory_space<vmem>>, vector<128x8xbf16>
    %cst_14 = arith.constant dense<0.000000e+00> : vector<8x8xf32>
    %19 = tpu.matmul %17, %18, %cst_14 {dimension_numbers = #tpu.dot_dimension_numbers<[1], [0], [0], [1], [0, 0, 1, 1], [], []>} : vector<8x128xbf16>, vector<128x8xbf16>, vector<8x8xf32> -> vector<8x8xf32>
    %c0_15 = arith.constant 0 : index
    %c0_16 = arith.constant 0 : index
    %20 = vector.load %arg7[%c0_15, %c0_16] : memref<1x8xf32, #tpu.memory_space<vmem>>, vector<1x8xf32>
    %21 = vector.broadcast %20 : vector<1x8xf32> to vector<8x8xf32>
    %22 = arith.addf %19, %21 : vector<8x8xf32>
    %c0_17 = arith.constant 0 : index
    %c0_18 = arith.constant 0 : index
    %23 = vector.load %arg8[%c0_17, %c0_18] : memref<8x8xf32, #tpu.memory_space<vmem>>, vector<8x8xf32>
    tpu.vector_store %arg8[%c0_17, %c0_18], %22 {strides = array<i32>} : memref<8x8xf32, #tpu.memory_space<vmem>>, vector<8x8xf32>,
    return
  }
  func.func @transform_0(%arg0: i32) -> (i32, i32) {
    %c0_i32 = arith.constant 0 : i32
    %c0_i32_0 = arith.constant 0 : i32
    return %arg0, %c0_i32 : i32, i32
  }
  func.func @transform_1(%arg0: i32) -> (i32, i32) {
    %c0_i32 = arith.constant 0 : i32
    %c0_i32_0 = arith.constant 0 : i32
    %c0_i32_1 = arith.constant 0 : i32
    return %c0_i32, %c0_i32_0 : i32, i32
  }
  func.func @transform_2(%arg0: i32) -> (i32, i32) {
    %c0_i32 = arith.constant 0 : i32
    %c0_i32_0 = arith.constant 0 : i32
    %c0_i32_1 = arith.constant 0 : i32
    return %c0_i32, %c0_i32_0 : i32, i32
  }
  func.func @transform_3(%arg0: i32) -> (i32, i32) {
    %c0_i32 = arith.constant 0 : i32
    %c0_i32_0 = arith.constant 0 : i32
    %c0_i32_1 = arith.constant 0 : i32
    return %c0_i32, %c0_i32_0 : i32, i32
  }
  func.func @transform_4(%arg0: i32) -> (i32, i32) {
    %c0_i32 = arith.constant 0 : i32
    %c0_i32_0 = arith.constant 0 : i32
    %c0_i32_1 = arith.constant 0 : i32
    return %c0_i32, %c0_i32_0 : i32, i32
  }
  func.func @transform_5(%arg0: i32) -> (i32, i32) {
    %c0_i32 = arith.constant 0 : i32
    %c0_i32_0 = arith.constant 0 : i32
    %c0_i32_1 = arith.constant 0 : i32
    return %c0_i32, %c0_i32_0 : i32, i32
  }
  func.func @transform_6(%arg0: i32) -> (i32, i32) {
    %c0_i32 = arith.constant 0 : i32
    %c0_i32_0 = arith.constant 0 : i32
    %c0_i32_1 = arith.constant 0 : i32
    return %c0_i32, %c0_i32_0 : i32, i32
  }
  func.func @transform_7(%arg0: i32) -> (i32, i32) {
    %c0_i32 = arith.constant 0 : i32
    %c0_i32_0 = arith.constant 0 : i32
    return %arg0, %c0_i32 : i32, i32
  }
}

</mosaic_0001>

<bundles_post_ra>
// kernel: tpu_custom_call.1
= control target key start
LH: loop header
LB: loop body
LE: loop exit
PB: predicated region body
PF: predicated region fallthrough
CT: control target
= control target key end

     0   :  { %12 = vsyncpa [#allocation3], 0  ;;  %s654_s0 = inlined_call_operand.vmem [shape: f32[8,16], index: 0, kind: input, shape index: {}]   ;;  %s655_s1 = inlined_call_operand.hbm [shape: bf16[16,128], index: 1, kind: input, shape index: {}]   ;;  %s656_s2 = inlined_call_operand.vmem [shape: f32[1,128], index: 2, kind: input, shape index: {}]   ;;  %s657_s3 = inlined_call_operand.vmem [shape: bf16[128,128], index: 3, kind: input, shape index: {}]   ;;  %s658_s4 = inlined_call_operand.vmem [shape: f32[1,128], index: 4, kind: input, shape index: {}]   ;;  %s659_s5 = inlined_call_operand.vmem [shape: bf16[128,8], index: 5, kind: input, shape index: {}]   ;;  %s660_s6 = inlined_call_operand.vmem [shape: f32[1,8], index: 6, kind: input, shape index: {}]   ;;  %s661_s7 = inlined_call_operand.hbm [shape: f32[8,8], index: 7, kind: output, shape index: {}]  }
   0x1   :  { %13 = vsyncpa [#allocation4], 0  ;;  %s504_s24 = smov [#allocation2]   ;;  %s456_s28 = scalar_lea.hbm %s655_s1, 128 }
   0x2   :  { %s21_s25 = sshll.u32 %s504_s24, 4  ;;  %p457_p0 = scmp.ne.s32.totalorder %s655_s1, %s456_s28  ;;  %s22_s25 = int_to_ptr.vmem [resolvable:$true] %s21_s25 }
   0x3   :  { %p460_p1 = scmp.lt.u32.totalorder %s456_s28, %s655_s1 }
   0x5   :  { %p462_p2 = pnand %p460_p1, %p457_p0 }
   0x7   :  { %465 = shalt.err (!%p462_p2)
}
   0x8   :  { %s466_s10 = scalar_lea.vmem %s22_s25, 128  ;;  %p471_p4 = scmp.lt.s32.totalorder %s22_s25, %s22_s25 }
   0x9   :  { %p467_p3 = scmp.ne.s32.totalorder %s22_s25, %s466_s10  ;;  %p472_p5 = scmp.lt.s32.totalorder %s466_s10, %s466_s10 }
   0xb   :  { %p473_p6 = por %p472_p5, %p471_p4 }
   0xd   :  { %p474_p7 = pnand %p473_p6, %p467_p3 }
   0xf   :  { %477 = shalt.err (!%p474_p7)
}
  0x10   :  { %s505_s11 = smov 64   ;;  %s506_s12 = smov 4  }
  0x11   :  { %27 = dma.hbm_to_vmem [thread:$0]  %s655_s1, 128, %s22_s25, [#allocation3], %s505_s11, %s505_s11, %s506_s12  }
  0x12   :  { %500 = dma.done.wait [#allocation3], 128  }
  0x13   :  { %501 = vsyncadd [#allocation3], 4294967168  ;;  %v507_v0 = vmov 0.0   ;;  %vm508_vm0 = vmmov 0   ;;  %v439_v1 = vld [vmem:[#allocation2] sm:$0xff]   ;;  %vm59_vm1 = vcmask 130048  }
  0x14   :  { %387 = vmatprep.subr.bf16.mxu0 %v507_v0  ;;  %389 = vmatprep.mubr.msk.bf16.mxu0 %vm508_vm0, %v507_v0  ;;  %v42_v2 = vld [vmem:[%s654_s0] sm:$0xff]  ;;  %v441_v5 = vld [vmem:[%s657_s3 + $0x8] sm:$0xff]   ;;  %v442_v6 = vld [vmem:[%s657_s3 + $0x10] sm:$0xff]   ;;  %s509_s26 = smov [#allocation5]   ;;  %vm329_vm2 = vcmask 64512  }
  0x15   :  { %393 = vmatprep.subr.bf16.mxu1 %v507_v0  ;;  %409 = vmatprep.mubr.msk.bf16.mxu1 %vm508_vm0, %v507_v0  ;;  %v43_v3 = vpack.c.bf16 %v42_v2, %v42_v2  ;;  %v440_v4 = vld [vmem:[%s657_s3] sm:$0xff]   ;;  %v443_v7 = vld [vmem:[%s657_s3 + $0x18] sm:$0xff]   ;;  %v445_v9 = vld [vmem:[%s657_s3 + $0x28] sm:$0xff]   ;;  %s337_s27 = sshll.u32 %s509_s26, 4  ;;  %s338_s27 = int_to_ptr.vmem [resolvable:$true] %s337_s27 }
  0x16   :  { %388 = vmatpush3.bf16.msra.mxu0 %v439_v1  ;;  %394 = vmatpush3.bf16.msra.mxu1 %v440_v4  ;;  %v444_v8 = vld [vmem:[%s657_s3 + $0x20] sm:$0xff]   ;;  %v446_v10 = vld [vmem:[%s657_s3 + $0x30] sm:$0xff]   ;;  %v447_v11 = vld [vmem:[%s657_s3 + $0x38] sm:$0xff]   ;;  %p483_p9 = scmp.lt.s32.totalorder %s338_s27, %s338_s27 }
  0x17   :  { %413 = vmatprep.subr.bf16.mxu0 %v507_v0  ;;  %395 = vmatprep.subr.bf16.mxu1 %v507_v0  ;;  %v448_v12 = vld [vmem:[%s659_s5] sm:$0xff]   ;;  %v449_v13 = vld [vmem:[%s659_s5 + $0x8] sm:$0xff]   ;;  %v450_v14 = vld [vmem:[%s659_s5 + $0x10] sm:$0xff]  }
  0x18   :  { %v451_v15 = vld [vmem:[%s659_s5 + $0x18] sm:$0xff]   ;;  %v452_v16 = vld [vmem:[%s659_s5 + $0x20] sm:$0xff]   ;;  %v453_v17 = vld [vmem:[%s659_s5 + $0x28] sm:$0xff]  }
  0x19   :  { %390 = vmatmul.mubr.msk.bf16.vlgmr.msra.gmra.mrb[0].mxu0 %vm59_vm1, %v43_v3  ;;  %v346_v18 = vld [vmem:[%s656_s2] ss:$0 sm:$0xff]  ;;  %v454_v26 = vld [vmem:[%s659_s5 + $0x30] sm:$0xff]   ;;  %v455_v27 = vld [vmem:[%s659_s5 + $0x38] sm:$0xff]  }
  0x1a   :  { %429 = vmatprep.mubr.msk.bf16.mxu0 %vm508_vm0, %v507_v0  ;;  %396 = vmatpush3.bf16.msra.mxu1 %v441_v5  ;;  %v349_v28 = vld [vmem:[%s658_s4] ss:$0 sm:$0xff]  ;;  %s478_s4 = scalar_lea.vmem %s338_s27, 128 }
  0x1b   :  { %397 = vmatprep.subr.bf16.mxu1 %v507_v0  ;;  %414 = vmatpush3.bf16.msra.mxu0 %v448_v12  ;;  %v358_v36 = vld [vmem:[%s660_s6] ss:$0 sm:$0xff]  ;;  %p479_p8 = scmp.ne.s32.totalorder %s338_s27, %s478_s4  ;;  %p484_p10 = scmp.lt.s32.totalorder %s478_s4, %s478_s4 }
  0x1c   :  { %415 = vmatprep.subr.bf16.mxu0 %v507_v0 }
  0x1d   :  { %p485_p11 = por %p484_p10, %p483_p9 }
  0x1e   :  { %398 = vmatpush3.bf16.msra.mxu1 %v442_v6 }
  0x1f   :  { %399 = vmatprep.subr.bf16.mxu1 %v507_v0  ;;  %416 = vmatpush3.bf16.msra.mxu0 %v449_v13  ;;  %p486_p12 = pnand %p485_p11, %p479_p8 }
  0x20   :  { %417 = vmatprep.subr.bf16.mxu0 %v507_v0 }
  0x22   :  { %400 = vmatpush3.bf16.msra.mxu1 %v443_v7 }
  0x23   :  { %401 = vmatprep.subr.bf16.mxu1 %v507_v0  ;;  %418 = vmatpush3.bf16.msra.mxu0 %v450_v14 }
  0x24   :  { %419 = vmatprep.subr.bf16.mxu0 %v507_v0 }
  0x26   :  { %402 = vmatpush3.bf16.msra.mxu1 %v444_v8 }
  0x27   :  { %403 = vmatprep.subr.bf16.mxu1 %v507_v0  ;;  %420 = vmatpush3.bf16.msra.mxu0 %v451_v15 }
  0x28   :  { %421 = vmatprep.subr.bf16.mxu0 %v507_v0 }
  0x2a   :  { %404 = vmatpush3.bf16.msra.mxu1 %v445_v9 }
  0x2b   :  { %405 = vmatprep.subr.bf16.mxu1 %v507_v0  ;;  %422 = vmatpush3.bf16.msra.mxu0 %v452_v16 }
  0x2c   :  { %423 = vmatprep.subr.bf16.mxu0 %v507_v0 }
  0x2e   :  { %406 = vmatpush3.bf16.msra.mxu1 %v446_v10 }
  0x2f   :  { %407 = vmatprep.subr.bf16.mxu1 %v507_v0  ;;  %424 = vmatpush3.bf16.msra.mxu0 %v453_v17 }
  0x30   :  { %425 = vmatprep.subr.bf16.mxu0 %v507_v0 }
  0x32   :  { %408 = vmatpush3.bf16.msra.mxu1 %v447_v11 }
  0x33   :  { %426 = vmatpush3.bf16.msra.mxu0 %v454_v26 }
  0x34   :  { %427 = vmatprep.subr.bf16.mxu0 %v507_v0 }
  0x37   :  { %428 = vmatpush3.bf16.msra.mxu0 %v455_v27 }
  0xec   :  { %v97_v19 = vpop.f32.mrb[0].mxu0 }
  0xed   :  { %v98_v20 = vadd.f32 %v346_v18, %v97_v19  ;;  %v391_v21 = vpop.f32.mrb[1].mxu0 }
  0xee   :  { %v100_v22 = vpop.f32.mrb[2].mxu0 }
  0xef   :  { %v103_v23 = vmax.f32 %v98_v20, 0.0  ;;  %v392_v24 = vpop.f32.mrb[3].mxu0 }
  0xf1   :  { %v104_v25 = vpack.c.bf16 %v103_v23, %v103_v23 }
  0xf3   :  { %410 = vmatmul.mubr.bf16.vlgmr.msra.gmra.mrb[0].mxu1 %v104_v25 }
 0x1c6   :  { %v210_v29 = vpop.f32.mrb[0].mxu1 }
 0x1c7   :  { %v211_v30 = vadd.f32 %v349_v28, %v210_v29  ;;  %v411_v31 = vpop.f32.mrb[1].mxu1 }
 0x1c8   :  { %v213_v32 = vpop.f32.mrb[2].mxu1 }
 0x1c9   :  { %v216_v33 = vmax.f32 %v211_v30, 0.0  ;;  %v412_v34 = vpop.f32.mrb[3].mxu1 }
 0x1cb   :  { %v217_v35 = vpack.c.bf16 %v216_v33, %v216_v33 }
 0x1cd   :  { %430 = vmatmul.mubr.bf16.vlgmr.msra.gmra.mrb[4].mxu0 %v217_v35 }
 0x2a0   :  { %v323_v37 = vpop.f32.mrb[4].mxu0 }
 0x2a1   :  { %v324_v38 = vadd.f32 %v358_v36, %v323_v37  ;;  %v431_v39 = vpop.f32.mrb[5].mxu0 }
 0x2a2   :  { %v326_v40 = vpop.f32.mrb[6].mxu0 }
 0x2a3   :  { %v432_v41 = vpop.f32.mrb[7].mxu0  ;;  %330 = vst.msk [vmem:[#allocation5] sm:$0xff] %vm329_vm2, %v324_v38 }
 0x2a4   :  { %489 = shalt.err (!%p486_p12)
}
 0x2a5   :  { %s490_s6 = scalar_lea.hbm %s661_s7, 128 }
 0x2a6   :  { %p491_p13 = scmp.ne.s32.totalorder %s661_s7, %s490_s6  ;;  %p494_p0 = scmp.lt.u32.totalorder %s490_s6, %s661_s7 }
 0x2a8   :  { %p496_p1 = pnand %p494_p0, %p491_p13 }
 0x2aa   :  { %499 = shalt.err (!%p496_p1)
}
 0x2ab   :  { %340 = dma.vmem_to_hbm [thread:$0]  %s338_s27, 128, %s661_s7, [#allocation4]  }
 0x2ac   :  { %502 = dma.done.wait [#allocation4], 128  }
 0x2ad   :  { %503 = vsyncadd [#allocation4], 4294967168 }
 0x2ae   :  { %344 = vsyncpa [#allocation3], 1 }
 0x2af   :  { %345 = vsyncpa [#allocation4], 1 }

</bundles_post_ra>
